<compile_context>
chip_gen: v7x
topology: tpu7x:2x2x1
jax: 0.10.0
libtpu: 0.0.40
codegen_flags: <defaults>
</compile_context>

<pallas_src>
import functools

import jax
import jax.numpy as jnp
from jax.experimental import pallas as pl
from jax.experimental.pallas import tpu as pltpu

NEG_BIG = -1e30       # masks padded action lanes: exp(NEG_BIG - m) == 0
TB_MAX = 2048         # per-step batch tile cap (VMEM-safe on v5e/v6e/v7x)


def _round_up(n, m):
    return ((n + m - 1) // m) * m


def _cdiv(a, b):
    return (a + b - 1) // b


def _choose_tb(batch):
    """Batch rows per grid step: as large as possible (amortize ~0.35us/step),
    a multiple of 8 sublanes, and yielding >=2 grid steps whenever the batch
    is big enough (so both v7x TensorCores get work)."""
    b8 = _round_up(max(batch, 1), 8)
    n_steps = max(_cdiv(b8, TB_MAX), 2) if b8 >= 16 else 1
    return _round_up(_cdiv(b8, n_steps), 8)


def actor_kernel(pack_off, x_ref, w1_ref, w2_ref, w3_ref,
                 b1_ref, b2_ref, b3_ref, out_ref):
    x = x_ref[...]                                            # (TB, S) bf16

    # fc1 + relu   (MXU matmul, f32 accumulate; bias add on the VPU)
    h1 = jnp.dot(x, w1_ref[...], preferred_element_type=jnp.float32)
    h1 = jnp.maximum(h1 + b1_ref[...], 0.0).astype(jnp.bfloat16)

    # fc2 + relu
    h2 = jnp.dot(h1, w2_ref[...], preferred_element_type=jnp.float32)
    h2 = jnp.maximum(h2 + b2_ref[...], 0.0).astype(jnp.bfloat16)

    # fc3 -> logits; padded action lanes carry NEG_BIG via b3 -> exp() == 0
    logits = jnp.dot(h2, w3_ref[...], preferred_element_type=jnp.float32)
    logits = logits + b3_ref[...]

    # numerically stable softmax over the lane-dense action axis (f32, exact
    # divide so rows are normalized up to the final bf16 rounding)
    m = jnp.max(logits, axis=-1, keepdims=True)
    e = jnp.exp(logits - m)
    probs = e / jnp.sum(e, axis=-1, keepdims=True)

    # pack [probs | logits] into a single lane-dense 128-wide block:
    #   lanes [0, pack_off)   -> probs
    #   lanes [pack_off, 128) -> logits (rolled up by pack_off lanes, XLU)
    lane = jax.lax.broadcasted_iota(jnp.int32, logits.shape, 1)
    packed = jnp.where(lane < pack_off, probs,
                       pltpu.roll(logits, shift=pack_off, axis=1))
    out_ref[...] = packed.astype(out_ref.dtype)


def pack_params(params):
    """Lane-pad weights to bf16 matrices and biases to tiny f32 rows.

    Returns (w1p, w2p, w3p, b1p, b2p, b3p, dims) with
      w1p (S, Hp) bf16, w2p (Hp, Hp) bf16, w3p (Hp, Ap) bf16,
      b1p (1, Hp) f32,  b2p (1, Hp) f32,
      b3p (1, Ap) f32 with NEG_BIG on padded action lanes.
    """
    w1, b1, w2, b2, w3, b3 = params
    state_dim, hidden = w1.shape
    action_dim = w3.shape[1]
    Hp = _round_up(hidden, 128)
    Ap = _round_up(action_dim, 128)
    pack_off = Ap // 2
    assert action_dim <= pack_off, "output packing needs action_dim <= Ap // 2"

    w1p = jnp.zeros((state_dim, Hp), jnp.float32).at[:, :hidden].set(w1)
    w2p = jnp.zeros((Hp, Hp), jnp.float32).at[:hidden, :hidden].set(w2)
    w3p = jnp.zeros((Hp, Ap), jnp.float32).at[:hidden, :action_dim].set(w3)

    b1p = jnp.zeros((1, Hp), jnp.float32).at[:, :hidden].set(b1.reshape(1, -1))
    b2p = jnp.zeros((1, Hp), jnp.float32).at[:, :hidden].set(b2.reshape(1, -1))
    b3p = jnp.full((1, Ap), NEG_BIG, jnp.float32).at[:, :action_dim].set(
        b3.reshape(1, -1))

    dims = dict(state_dim=state_dim, hidden=hidden, action_dim=action_dim,
                Hp=Hp, Ap=Ap, pack_off=pack_off)
    return (w1p.astype(jnp.bfloat16), w2p.astype(jnp.bfloat16),
            w3p.astype(jnp.bfloat16), b1p, b2p, b3p, dims)


def actor_forward(x_nchw, packed):
    """x_nchw: (B, C, H, W) float32. Returns (probs, logits), each (B, A) f32."""
    w1p, w2p, w3p, b1p, b2p, b3p, dims = packed
    state_dim = dims["state_dim"]
    action_dim = dims["action_dim"]
    Hp, Ap, pack_off = dims["Hp"], dims["Ap"], dims["pack_off"]

    B = x_nchw.shape[0]
    # glue: PyTorch x.view(-1, state_dim) — row-major flatten of (C, H, W);
    # cast straight to bf16 (matmul operand precision), pad rows only.
    x2d = x_nchw.reshape(B, -1).astype(jnp.bfloat16)
    assert x2d.shape[1] == state_dim

    TB = _choose_tb(B)
    B_pad = _round_up(B, TB)
    if B_pad != B:
        x2d = jnp.pad(x2d, ((0, B_pad - B), (0, 0)))

    kernel = functools.partial(actor_kernel, pack_off)

    packed_out = pl.pallas_call(
        kernel,
        out_shape=jax.ShapeDtypeStruct((B_pad, Ap), jnp.bfloat16),
        grid=(B_pad // TB,),
        in_specs=[
            pl.BlockSpec((TB, state_dim), lambda i: (i, 0)),  # x tile, pipelined
            pl.BlockSpec((state_dim, Hp), lambda i: (0, 0)),  # weights / biases
            pl.BlockSpec((Hp, Hp), lambda i: (0, 0)),         # stay VMEM-resident
            pl.BlockSpec((Hp, Ap), lambda i: (0, 0)),
            pl.BlockSpec((1, Hp), lambda i: (0, 0)),
            pl.BlockSpec((1, Hp), lambda i: (0, 0)),
            pl.BlockSpec((1, Ap), lambda i: (0, 0)),
        ],
        out_specs=pl.BlockSpec((TB, Ap), lambda i: (i, 0)),
        compiler_params=pltpu.CompilerParams(
            dimension_semantics=("parallel",),        # v7x: shard over both TCs
            vmem_limit_bytes=32 * 1024 * 1024),       # headroom for big TB
    )(x2d, w1p, w2p, w3p, b1p, b2p, b3p)

    # unpack the single bf16 block and strip batch / action padding.
    # NOTE: probs are bf16-rounded on store; renormalize downstream if exact
    # row sums of 1.0 are required.
    probs = packed_out[:B, :action_dim].astype(jnp.float32)
    logits = packed_out[:B, pack_off:pack_off + action_dim].astype(jnp.float32)
    # TODO(synk): torch.distributions.Categorical has no Pallas equivalent;
    # `logits` is exactly what Categorical(logits=logits) would consume.
    return probs, logits


def init_params(key, state_dim, hidden, action_dim):
    """Deterministic PyTorch-style init; weights stored (in, out) for x @ W."""
    ks = jax.random.split(key, 6)

    def lin(kw, kb, fan_in, fan_out):
        bound = 1.0 / jnp.sqrt(fan_in)
        w = jax.random.uniform(kw, (fan_in, fan_out), jnp.float32, -bound, bound)
        b = jax.random.uniform(kb, (1, fan_out), jnp.float32, -bound, bound)
        return w, b

    w1, b1 = lin(ks[0], ks[1], state_dim, hidden)
    w2, b2 = lin(ks[2], ks[3], hidden, hidden)
    w3, b3 = lin(ks[4], ks[5], hidden, action_dim)
    return (w1, b1, w2, b2, w3, b3)


def ref_forward(x_nchw, params):
    """Plain-JAX reference with the same bf16 operand rounding as the kernel
    (biases stay f32, as in the kernel)."""
    def q(a):  # bf16 round-trip (matmul-operand precision)
        return a.astype(jnp.bfloat16).astype(jnp.float32)

    w1, b1, w2, b2, w3, b3 = params
    x = q(x_nchw.reshape(x_nchw.shape[0], -1).astype(jnp.float32))
    h1 = q(jnp.maximum(x @ q(w1) + b1, 0.0))
    h2 = q(jnp.maximum(h1 @ q(w2) + b2, 0.0))
    logits = h2 @ q(w3) + b3
    return jax.nn.softmax(logits, axis=-1), logits


if __name__ == "__main__":
    key = jax.random.PRNGKey(0)
    k_x, k_p = jax.random.split(key)

    # small multigrid-like observation: batch=2, channels=4, spatial=4x4
    B, C, H, W = 2, 4, 4, 4
    state_dim = C * H * W          # 64
    hidden = 64
    action_dim = 7                 # typical multigrid action space

    x = jax.random.normal(k_x, (B, C, H, W), dtype=jnp.float32)
    params = init_params(k_p, state_dim, hidden, action_dim)
    packed = pack_params(params)

    probs, logits = actor_forward(x, packed)
    jax.block_until_ready((probs, logits))

    # reference check
    pr, lr = ref_forward(x, params)
    assert probs.shape == (B, action_dim) and logits.shape == (B, action_dim)
    assert jnp.allclose(logits, lr, atol=3e-2, rtol=3e-2), \
        f"logits mismatch, max abs err {jnp.max(jnp.abs(logits - lr))}"
    assert jnp.allclose(probs, pr, atol=3e-2, rtol=3e-2), \
        f"probs mismatch, max abs err {jnp.max(jnp.abs(probs - pr))}"
    assert jnp.allclose(jnp.sum(probs, axis=-1), 1.0, atol=1e-2)

    print("KERNEL_OK")
</pallas_src>

<mosaic_0001>
module attributes {stable_mosaic.version = 11 : i64} {
  func.func @actor_kernel(%arg0: i32, %arg1: memref<8x64xbf16, #tpu.memory_space<vmem>>, %arg2: memref<64x128xbf16, #tpu.memory_space<vmem>>, %arg3: memref<128x128xbf16, #tpu.memory_space<vmem>>, %arg4: memref<128x128xbf16, #tpu.memory_space<vmem>>, %arg5: memref<1x128xf32, #tpu.memory_space<vmem>>, %arg6: memref<1x128xf32, #tpu.memory_space<vmem>>, %arg7: memref<1x128xf32, #tpu.memory_space<vmem>>, %arg8: memref<8x128xbf16, #tpu.memory_space<vmem>>) attributes {dimension_semantics = [#tpu.dimension_semantics<parallel>], iteration_bounds = array<i64: 1>, scalar_prefetch = 0 : i64, scratch_operands = 0 : i64, tpu.core_type = #tpu.core_type<tc>, window_params = [{transform_indices = @transform_0, window_bounds = array<i64: 8, 64>}, {pipeline_mode = #tpu.pipeline_mode<synchronous>, transform_indices = @transform_1, window_bounds = array<i64: 64, 128>}, {pipeline_mode = #tpu.pipeline_mode<synchronous>, transform_indices = @transform_2, window_bounds = array<i64: 128, 128>}, {pipeline_mode = #tpu.pipeline_mode<synchronous>, transform_indices = @transform_3, window_bounds = array<i64: 128, 128>}, {pipeline_mode = #tpu.pipeline_mode<synchronous>, transform_indices = @transform_4, window_bounds = array<i64: 1, 128>}, {pipeline_mode = #tpu.pipeline_mode<synchronous>, transform_indices = @transform_5, window_bounds = array<i64: 1, 128>}, {pipeline_mode = #tpu.pipeline_mode<synchronous>, transform_indices = @transform_6, window_bounds = array<i64: 1, 128>}, {transform_indices = @transform_7, window_bounds = array<i64: 8, 128>}]} {
    %c0 = arith.constant 0 : index
    %c0_0 = arith.constant 0 : index
    %0 = vector.load %arg1[%c0, %c0_0] : memref<8x64xbf16, #tpu.memory_space<vmem>>, vector<8x64xbf16>
    %c0_1 = arith.constant 0 : index
    %c0_2 = arith.constant 0 : index
    %1 = vector.load %arg2[%c0_1, %c0_2] : memref<64x128xbf16, #tpu.memory_space<vmem>>, vector<64x128xbf16>
    %cst = arith.constant dense<0.000000e+00> : vector<8x128xf32>
    %2 = tpu.matmul %0, %1, %cst {dimension_numbers = #tpu.dot_dimension_numbers<[1], [0], [0], [1], [0, 0, 1, 1], [], []>} : vector<8x64xbf16>, vector<64x128xbf16>, vector<8x128xf32> -> vector<8x128xf32>
    %c0_3 = arith.constant 0 : index
    %c0_4 = arith.constant 0 : index
    %3 = vector.load %arg5[%c0_3, %c0_4] : memref<1x128xf32, #tpu.memory_space<vmem>>, vector<1x128xf32>
    %4 = vector.broadcast %3 : vector<1x128xf32> to vector<8x128xf32>
    %5 = arith.addf %2, %4 : vector<8x128xf32>
    %cst_5 = arith.constant 0.000000e+00 : f32
    %6 = vector.broadcast %cst_5 : f32 to vector<8x128xf32>
    %7 = arith.maximumf %5, %6 : vector<8x128xf32>
    %8 = arith.truncf %7 : vector<8x128xf32> to vector<8x128xbf16>
    %c0_6 = arith.constant 0 : index
    %c0_7 = arith.constant 0 : index
    %9 = vector.load %arg3[%c0_6, %c0_7] : memref<128x128xbf16, #tpu.memory_space<vmem>>, vector<128x128xbf16>
    %cst_8 = arith.constant dense<0.000000e+00> : vector<8x128xf32>
    %10 = tpu.matmul %8, %9, %cst_8 {dimension_numbers = #tpu.dot_dimension_numbers<[1], [0], [0], [1], [0, 0, 1, 1], [], []>} : vector<8x128xbf16>, vector<128x128xbf16>, vector<8x128xf32> -> vector<8x128xf32>
    %c0_9 = arith.constant 0 : index
    %c0_10 = arith.constant 0 : index
    %11 = vector.load %arg6[%c0_9, %c0_10] : memref<1x128xf32, #tpu.memory_space<vmem>>, vector<1x128xf32>
    %12 = vector.broadcast %11 : vector<1x128xf32> to vector<8x128xf32>
    %13 = arith.addf %10, %12 : vector<8x128xf32>
    %cst_11 = arith.constant 0.000000e+00 : f32
    %14 = vector.broadcast %cst_11 : f32 to vector<8x128xf32>
    %15 = arith.maximumf %13, %14 : vector<8x128xf32>
    %16 = arith.truncf %15 : vector<8x128xf32> to vector<8x128xbf16>
    %c0_12 = arith.constant 0 : index
    %c0_13 = arith.constant 0 : index
    %17 = vector.load %arg4[%c0_12, %c0_13] : memref<128x128xbf16, #tpu.memory_space<vmem>>, vector<128x128xbf16>
    %cst_14 = arith.constant dense<0.000000e+00> : vector<8x128xf32>
    %18 = tpu.matmul %16, %17, %cst_14 {dimension_numbers = #tpu.dot_dimension_numbers<[1], [0], [0], [1], [0, 0, 1, 1], [], []>} : vector<8x128xbf16>, vector<128x128xbf16>, vector<8x128xf32> -> vector<8x128xf32>
    %c0_15 = arith.constant 0 : index
    %c0_16 = arith.constant 0 : index
    %19 = vector.load %arg7[%c0_15, %c0_16] : memref<1x128xf32, #tpu.memory_space<vmem>>, vector<1x128xf32>
    %20 = vector.broadcast %19 : vector<1x128xf32> to vector<8x128xf32>
    %21 = arith.addf %18, %20 : vector<8x128xf32>
    %cst_17 = arith.constant dense<0xFF800000> : vector<8xf32>
    %22 = vector.multi_reduction <maximumf>, %21, %cst_17 [1] : vector<8x128xf32> to vector<8xf32>
    %23 = vector.shape_cast %22 : vector<8xf32> to vector<8x1xf32>
    %24 = vector.broadcast %23 : vector<8x1xf32> to vector<8x128xf32>
    %25 = arith.subf %21, %24 : vector<8x128xf32>
    %26 = math.exp %25 : vector<8x128xf32>
    %cst_18 = arith.constant dense<0.000000e+00> : vector<8xf32>
    %27 = vector.multi_reduction <add>, %26, %cst_18 [1] : vector<8x128xf32> to vector<8xf32>
    %28 = vector.shape_cast %27 : vector<8xf32> to vector<8x1xf32>
    %29 = vector.broadcast %28 : vector<8x1xf32> to vector<8x128xf32>
    %30 = arith.divf %26, %29 : vector<8x128xf32>
    %31 = tpu.iota {dimensions = array<i32: 1>} : vector<8x128xi32>
    %c64_i32 = arith.constant 64 : i32
    %32 = vector.broadcast %c64_i32 : i32 to vector<8x128xi32>
    %33 = arith.cmpi slt, %31, %32 : vector<8x128xi32>
    %c64_i32_19 = arith.constant 64 : i32
    %34 = tpu.dynamic_rotate %21 by %c64_i32_19 dim 1 : vector<8x128xf32>, i32 -> vector<8x128xf32>
    %35 = arith.select %33, %30, %34 : vector<8x128xi1>, vector<8x128xf32>
    %36 = arith.truncf %35 : vector<8x128xf32> to vector<8x128xbf16>
    %c0_20 = arith.constant 0 : index
    %c0_21 = arith.constant 0 : index
    %37 = vector.load %arg8[%c0_20, %c0_21] : memref<8x128xbf16, #tpu.memory_space<vmem>>, vector<8x128xbf16>
    tpu.vector_store %arg8[%c0_20, %c0_21], %36 {strides = array<i32>} : memref<8x128xbf16, #tpu.memory_space<vmem>>, vector<8x128xbf16>,
    return
  }
  func.func @transform_0(%arg0: i32) -> (i32, i32) {
    %c0_i32 = arith.constant 0 : i32
    %c0_i32_0 = arith.constant 0 : i32
    return %arg0, %c0_i32 : i32, i32
  }
  func.func @transform_1(%arg0: i32) -> (i32, i32) {
    %c0_i32 = arith.constant 0 : i32
    %c0_i32_0 = arith.constant 0 : i32
    %c0_i32_1 = arith.constant 0 : i32
    return %c0_i32, %c0_i32_0 : i32, i32
  }
  func.func @transform_2(%arg0: i32) -> (i32, i32) {
    %c0_i32 = arith.constant 0 : i32
    %c0_i32_0 = arith.constant 0 : i32
    %c0_i32_1 = arith.constant 0 : i32
    return %c0_i32, %c0_i32_0 : i32, i32
  }
  func.func @transform_3(%arg0: i32) -> (i32, i32) {
    %c0_i32 = arith.constant 0 : i32
    %c0_i32_0 = arith.constant 0 : i32
    %c0_i32_1 = arith.constant 0 : i32
    return %c0_i32, %c0_i32_0 : i32, i32
  }
  func.func @transform_4(%arg0: i32) -> (i32, i32) {
    %c0_i32 = arith.constant 0 : i32
    %c0_i32_0 = arith.constant 0 : i32
    %c0_i32_1 = arith.constant 0 : i32
    return %c0_i32, %c0_i32_0 : i32, i32
  }
  func.func @transform_5(%arg0: i32) -> (i32, i32) {
    %c0_i32 = arith.constant 0 : i32
    %c0_i32_0 = arith.constant 0 : i32
    %c0_i32_1 = arith.constant 0 : i32
    return %c0_i32, %c0_i32_0 : i32, i32
  }
  func.func @transform_6(%arg0: i32) -> (i32, i32) {
    %c0_i32 = arith.constant 0 : i32
    %c0_i32_0 = arith.constant 0 : i32
    %c0_i32_1 = arith.constant 0 : i32
    return %c0_i32, %c0_i32_0 : i32, i32
  }
  func.func @transform_7(%arg0: i32) -> (i32, i32) {
    %c0_i32 = arith.constant 0 : i32
    %c0_i32_0 = arith.constant 0 : i32
    return %arg0, %c0_i32 : i32, i32
  }
}

</mosaic_0001>

<bundles_post_ra>
// kernel: tpu_custom_call.1
= control target key start
LH: loop header
LB: loop body
LE: loop exit
PB: predicated region body
PF: predicated region fallthrough
CT: control target
= control target key end

     0   :  { %12 = vsyncpa [#allocation3], 0  ;;  %s829_s0 = inlined_call_operand.hbm [shape: bf16[8,64], index: 0, kind: input, shape index: {}]   ;;  %s830_s1 = inlined_call_operand.hbm [shape: bf16[64,128], index: 1, kind: input, shape index: {}]   ;;  %s831_s2 = inlined_call_operand.hbm [shape: bf16[128,128], index: 2, kind: input, shape index: {}]   ;;  %s832_s3 = inlined_call_operand.hbm [shape: bf16[128,128], index: 3, kind: input, shape index: {}]   ;;  %s833_s4 = inlined_call_operand.vmem [shape: f32[1,128], index: 4, kind: input, shape index: {}]   ;;  %s834_s5 = inlined_call_operand.vmem [shape: f32[1,128], index: 5, kind: input, shape index: {}]   ;;  %s835_s6 = inlined_call_operand.vmem [shape: f32[1,128], index: 6, kind: input, shape index: {}]   ;;  %s836_s7 = inlined_call_operand.hbm [shape: bf16[8,128], index: 7, kind: output, shape index: {}]  }
   0x1   :  { %13 = vsyncpa [#allocation6], 0 }
   0x2   :  { %14 = vsyncpa [#allocation9], 0 }
   0x3   :  { %15 = vsyncpa [#allocation4], 0  ;;  %s675_s24 = smov [#allocation5]   ;;  %s557_s28 = scalar_lea.hbm %s830_s1, 512 }
   0x4   :  { %s31_s25 = sshll.u32 %s675_s24, 4  ;;  %p558_p0 = scmp.ne.s32.totalorder %s830_s1, %s557_s28  ;;  %s32_s25 = int_to_ptr.vmem [resolvable:$true] %s31_s25 }
   0x5   :  { %p561_p1 = scmp.lt.u32.totalorder %s557_s28, %s830_s1 }
   0x7   :  { %p563_p2 = pnand %p561_p1, %p558_p0 }
   0x9   :  { %566 = shalt.err (!%p563_p2)
}
   0xa   :  { %s567_s10 = scalar_lea.vmem %s32_s25, 512  ;;  %p572_p4 = scmp.lt.s32.totalorder %s32_s25, %s32_s25 }
   0xb   :  { %p568_p3 = scmp.ne.s32.totalorder %s32_s25, %s567_s10  ;;  %p573_p5 = scmp.lt.s32.totalorder %s567_s10, %s567_s10 }
   0xd   :  { %p574_p6 = por %p573_p5, %p572_p4 }
   0xf   :  { %p575_p7 = pnand %p574_p6, %p568_p3 }
  0x11   :  { %578 = shalt.err (!%p575_p7)
}
  0x12   :  { %s676_s11 = smov 64   ;;  %s677_s12 = smov 4  }
  0x13   :  { %37 = dma.hbm_to_vmem [thread:$0]  %s830_s1, 512, %s32_s25, [#allocation6], %s676_s11, %s676_s11, %s677_s12  }
  0x14   :  { %s678_s15 = smov [#allocation2]   ;;  %s679_s17 = smov [#allocation7]  }
  0x15   :  { %s22_s16 = sshll.u32 %s678_s15, 4  ;;  %s43_s18 = sshll.u32 %s679_s17, 4  ;;  %s23_s16 = int_to_ptr.vmem [resolvable:$true] %s22_s16  ;;  %s44_s18 = int_to_ptr.vmem [resolvable:$true] %s43_s18 }
  0x16   :  { %s579_s21 = scalar_lea.hbm %s829_s0, 64 }
  0x17   :  { %p580_p8 = scmp.ne.s32.totalorder %s829_s0, %s579_s21  ;;  %p583_p9 = scmp.lt.u32.totalorder %s579_s21, %s829_s0 }
  0x19   :  { %p585_p10 = pnand %p583_p9, %p580_p8 }
  0x1b   :  { %588 = shalt.err (!%p585_p10)
}
  0x1c   :  { %s589_s1 = scalar_lea.vmem %s23_s16, 64  ;;  %p594_p12 = scmp.lt.s32.totalorder %s23_s16, %s23_s16 }
  0x1d   :  { %p590_p11 = scmp.ne.s32.totalorder %s23_s16, %s589_s1  ;;  %p595_p13 = scmp.lt.s32.totalorder %s589_s1, %s589_s1 }
  0x1f   :  { %p596_p0 = por %p595_p13, %p594_p12 }
  0x21   :  { %p597_p1 = pnand %p596_p0, %p590_p11 }
  0x23   :  { %600 = shalt.err (!%p597_p1)
}
  0x24   :  { %25 = dma.hbm_to_vmem [thread:$0]  %s829_s0, 64, %s23_s16, [#allocation3]  }
  0x25   :  { %s601_s30 = scalar_lea.hbm %s831_s2, 1024 }
  0x26   :  { %p602_p2 = scmp.ne.s32.totalorder %s831_s2, %s601_s30  ;;  %p605_p3 = scmp.lt.u32.totalorder %s601_s30, %s831_s2 }
  0x28   :  { %p607_p4 = pnand %p605_p3, %p602_p2 }
  0x2a   :  { %610 = shalt.err (!%p607_p4)
}
  0x2b   :  { %s611_s14 = scalar_lea.vmem %s44_s18, 1024  ;;  %p616_p6 = scmp.lt.s32.totalorder %s44_s18, %s44_s18 }
  0x2c   :  { %p612_p5 = scmp.ne.s32.totalorder %s44_s18, %s611_s14  ;;  %p617_p7 = scmp.lt.s32.totalorder %s611_s14, %s611_s14 }
  0x2e   :  { %p618_p8 = por %p617_p7, %p616_p6 }
  0x30   :  { %p619_p9 = pnand %p618_p8, %p612_p5 }
  0x32   :  { %622 = shalt.err (!%p619_p9)
}
  0x33   :  { %49 = dma.hbm_to_vmem [thread:$0]  %s831_s2, 1024, %s44_s18, [#allocation6], %s676_s11, %s676_s11, %s677_s12  }
  0x34   :  { %s680_s16 = smov [#allocation8]   ;;  %s623_s21 = scalar_lea.hbm %s832_s3, 1024 }
  0x35   :  { %s55_s17 = sshll.u32 %s680_s16, 4  ;;  %p624_p10 = scmp.ne.s32.totalorder %s832_s3, %s623_s21  ;;  %s56_s17 = int_to_ptr.vmem [resolvable:$true] %s55_s17 }
  0x36   :  { %p627_p11 = scmp.lt.u32.totalorder %s623_s21, %s832_s3 }
  0x38   :  { %p629_p12 = pnand %p627_p11, %p624_p10 }
  0x3a   :  { %632 = shalt.err (!%p629_p12)
}
  0x3b   :  { %s633_s1 = scalar_lea.vmem %s56_s17, 1024  ;;  %p638_p0 = scmp.lt.s32.totalorder %s56_s17, %s56_s17 }
  0x3c   :  { %p634_p13 = scmp.ne.s32.totalorder %s56_s17, %s633_s1  ;;  %p639_p1 = scmp.lt.s32.totalorder %s633_s1, %s633_s1 }
  0x3e   :  { %p640_p2 = por %p639_p1, %p638_p0 }
  0x40   :  { %p641_p3 = pnand %p640_p2, %p634_p13 }
  0x42   :  { %644 = shalt.err (!%p641_p3)
}
  0x43   :  { %61 = dma.hbm_to_vmem [thread:$0]  %s832_s3, 1024, %s56_s17, [#allocation9], %s676_s11, %s676_s11, %s677_s12  }
  0x44   :  { %667 = dma.done.wait [#allocation3], 64  }
  0x45   :  { %668 = vsyncadd [#allocation3], 4294967232 }
  0x46   :  { %669 = dma.done.wait [#allocation6], 1536  }
  0x47   :  { %670 = vsyncadd [#allocation6], 4294965760 }
  0x48   :  { %671 = dma.done.wait [#allocation9], 1024  }
  0x49   :  { %672 = vsyncadd [#allocation9], 4294966272  ;;  %v681_v0 = vmov 0.0   ;;  %vm682_vm0 = vmmov 0   ;;  %v533_v1 = vld [vmem:[#allocation5] sm:$0xff]   ;;  %v534_v2 = vld [vmem:[#allocation5 + $0x8] sm:$0xff]   ;;  %v400_v49 = vlaneseq }
  0x4a   :  { %472 = vmatprep.subr.bf16.mxu0 %v681_v0  ;;  %480 = vmatprep.mubr.msk.bf16.mxu0 %vm682_vm0, %v681_v0  ;;  %v537_v3 = vld [vmem:[#allocation7] sm:$0xff]   ;;  %v535_v4 = vld [vmem:[#allocation5 + $0x10] sm:$0xff]   ;;  %v538_v5 = vld [vmem:[#allocation7 + $0x8] sm:$0xff]   ;;  %vm121_vm1 = vcmask 523264  }
  0x4b   :  { %484 = vmatprep.subr.bf16.mxu1 %v681_v0  ;;  %500 = vmatprep.mubr.msk.bf16.mxu1 %vm682_vm0, %v681_v0  ;;  %v536_v6 = vld [vmem:[#allocation5 + $0x18] sm:$0xff]   ;;  %v539_v7 = vld [vmem:[#allocation7 + $0x10] sm:$0xff]   ;;  %v541_v10 = vld [vmem:[#allocation7 + $0x20] sm:$0xff]   ;;  %v401_v50 = vand.u32 127, %v400_v49 }
  0x4c   :  { %473 = vmatpush3.bf16.msra.mxu0 %v533_v1  ;;  %485 = vmatpush3.bf16.msra.mxu1 %v537_v3  ;;  %v81_v8 = vld [vmem:[#allocation2] sm:$0xf]  ;;  %v542_v11 = vld [vmem:[#allocation7 + $0x28] sm:$0xff]   ;;  %v543_v12 = vld [vmem:[#allocation7 + $0x30] sm:$0xff]  }
  0x4d   :  { %474 = vmatprep.subr.bf16.mxu0 %v681_v0  ;;  %486 = vmatprep.subr.bf16.mxu1 %v681_v0  ;;  %v540_v9 = vld [vmem:[#allocation7 + $0x18] sm:$0xff]   ;;  %v545_v14 = vld [vmem:[#allocation8] sm:$0xff]   ;;  %v546_v15 = vld [vmem:[#allocation8 + $0x8] sm:$0xff]   ;;  %vm402_vm2 = vcmp.lt.s32.totalorder %v401_v50, 64 }
  0x4e   :  { %v544_v13 = vld [vmem:[#allocation7 + $0x38] sm:$0xff]   ;;  %v547_v16 = vld [vmem:[#allocation8 + $0x10] sm:$0xff]   ;;  %v549_v18 = vld [vmem:[#allocation8 + $0x20] sm:$0xff]  }
  0x4f   :  { %v548_v17 = vld [vmem:[#allocation8 + $0x18] sm:$0xff]   ;;  %v550_v19 = vld [vmem:[#allocation8 + $0x28] sm:$0xff]   ;;  %v551_v28 = vld [vmem:[#allocation8 + $0x30] sm:$0xff]  }
  0x50   :  { %475 = vmatpush3.bf16.msra.mxu0 %v534_v2  ;;  %487 = vmatpush3.bf16.msra.mxu1 %v538_v5  ;;  %v425_v20 = vld [vmem:[%s833_s4] ss:$0 sm:$0xff] }
  0x51   :  { %476 = vmatprep.subr.bf16.mxu0 %v681_v0  ;;  %488 = vmatprep.subr.bf16.mxu1 %v681_v0  ;;  %v552_v29 = vld [vmem:[#allocation8 + $0x38] sm:$0xff]  }
  0x52   :  { %v431_v30 = vld [vmem:[%s834_s5] ss:$0 sm:$0xff]  ;;  %s683_s5 = smov [#allocation10]  }
  0x53   :  { %v440_v38 = vld [vmem:[%s835_s6] ss:$0 sm:$0xff]  ;;  %s414_s6 = sshll.u32 %s683_s5, 4  ;;  %s415_s6 = int_to_ptr.vmem [resolvable:$true] %s414_s6 }
  0x54   :  { %477 = vmatpush3.bf16.msra.mxu0 %v535_v4  ;;  %489 = vmatpush3.bf16.msra.mxu1 %v539_v7  ;;  %p650_p5 = scmp.lt.s32.totalorder %s415_s6, %s415_s6 }
  0x55   :  { %478 = vmatprep.subr.bf16.mxu0 %v681_v0  ;;  %490 = vmatprep.subr.bf16.mxu1 %v681_v0 }
  0x58   :  { %479 = vmatpush3.bf16.msra.mxu0 %v536_v6  ;;  %491 = vmatpush3.bf16.msra.mxu1 %v540_v9 }
  0x59   :  { %504 = vmatprep.subr.bf16.mxu0 %v681_v0  ;;  %492 = vmatprep.subr.bf16.mxu1 %v681_v0 }
  0x5b   :  { %481 = vmatmul.mubr.msk.bf16.vlgmr.msra.gmra.mrb[0].mxu0 %vm121_vm1, %v81_v8 }
  0x5c   :  { %520 = vmatprep.mubr.msk.bf16.mxu0 %vm682_vm0, %v681_v0  ;;  %493 = vmatpush3.bf16.msra.mxu1 %v541_v10 }
  0x5d   :  { %494 = vmatprep.subr.bf16.mxu1 %v681_v0  ;;  %505 = vmatpush3.bf16.msra.mxu0 %v545_v14 }
  0x5e   :  { %506 = vmatprep.subr.bf16.mxu0 %v681_v0 }
  0x60   :  { %495 = vmatpush3.bf16.msra.mxu1 %v542_v11 }
  0x61   :  { %496 = vmatprep.subr.bf16.mxu1 %v681_v0  ;;  %507 = vmatpush3.bf16.msra.mxu0 %v546_v15 }
  0x62   :  { %508 = vmatprep.subr.bf16.mxu0 %v681_v0 }
  0x64   :  { %497 = vmatpush3.bf16.msra.mxu1 %v543_v12 }
  0x65   :  { %498 = vmatprep.subr.bf16.mxu1 %v681_v0  ;;  %509 = vmatpush3.bf16.msra.mxu0 %v547_v16 }
  0x66   :  { %510 = vmatprep.subr.bf16.mxu0 %v681_v0 }
  0x68   :  { %499 = vmatpush3.bf16.msra.mxu1 %v544_v13 }
  0x69   :  { %511 = vmatpush3.bf16.msra.mxu0 %v548_v17 }
  0x6a   :  { %512 = vmatprep.subr.bf16.mxu0 %v681_v0 }
  0x6d   :  { %513 = vmatpush3.bf16.msra.mxu0 %v549_v18 }
  0x6e   :  { %514 = vmatprep.subr.bf16.mxu0 %v681_v0 }
  0x71   :  { %515 = vmatpush3.bf16.msra.mxu0 %v550_v19 }
  0x72   :  { %516 = vmatprep.subr.bf16.mxu0 %v681_v0 }
  0x75   :  { %517 = vmatpush3.bf16.msra.mxu0 %v551_v28 }
  0x76   :  { %518 = vmatprep.subr.bf16.mxu0 %v681_v0 }
  0x79   :  { %519 = vmatpush3.bf16.msra.mxu0 %v552_v29 }
 0x12e   :  { %v159_v21 = vpop.f32.mrb[0].mxu0 }
 0x12f   :  { %v160_v22 = vadd.f32 %v425_v20, %v159_v21  ;;  %v482_v23 = vpop.f32.mrb[1].mxu0 }
 0x130   :  { %v162_v24 = vpop.f32.mrb[2].mxu0 }
 0x131   :  { %v165_v25 = vmax.f32 %v160_v22, 0.0  ;;  %v483_v26 = vpop.f32.mrb[3].mxu0 }
 0x133   :  { %v166_v27 = vpack.c.bf16 %v165_v25, %v165_v25 }
 0x135   :  { %501 = vmatmul.mubr.bf16.vlgmr.msra.gmra.mrb[0].mxu1 %v166_v27 }
 0x208   :  { %v272_v31 = vpop.f32.mrb[0].mxu1 }
 0x209   :  { %v273_v32 = vadd.f32 %v431_v30, %v272_v31  ;;  %v502_v33 = vpop.f32.mrb[1].mxu1 }
 0x20a   :  { %v275_v34 = vpop.f32.mrb[2].mxu1 }
 0x20b   :  { %v278_v35 = vmax.f32 %v273_v32, 0.0  ;;  %v503_v36 = vpop.f32.mrb[3].mxu1 }
 0x20d   :  { %v279_v37 = vpack.c.bf16 %v278_v35, %v278_v35 }
 0x20f   :  { %521 = vmatmul.mubr.bf16.vlgmr.msra.gmra.mrb[4].mxu0 %v279_v37 }
 0x2e2   :  { %v385_v39 = vpop.f32.mrb[4].mxu0 }
 0x2e3   :  { %v386_v40 = vadd.f32 %v440_v38, %v385_v39  ;;  %v522_v41 = vpop.f32.mrb[5].mxu0 }
 0x2e4   :  { %v388_v42 = vpop.f32.mrb[6].mxu0 }
 0x2e5   :  { %403 = vrot.lane.b32.xlu1 %v386_v40, %s676_s11  ;;  %391 = vmax.xlane.f32.xlu0 %v386_v40  ;;  %v523_v43 = vpop.f32.mrb[7].mxu0  ;;  %s645_s11 = scalar_lea.vmem %s415_s6, 64 }
 0x2e6   :  { %p646_p4 = scmp.ne.s32.totalorder %s415_s6, %s645_s11  ;;  %p651_p6 = scmp.lt.s32.totalorder %s645_s11, %s645_s11 }
 0x2e8   :  { %p652_p7 = por %p651_p6, %p650_p5 }
 0x2ea   :  { %p653_p8 = pnand %p652_p7, %p646_p4 }
 0x357   :  { %v404_v53 = vpop.permute.xlu1 %403 }
 0x372   :  { %v392_v44 = vpop.xlane.xlu0 %391 }
 0x373   :  { %v393_v45 = vsub.f32 %v386_v40, %v392_v44 }
 0x375   :  { %v394_v46 = vmul.f32 1.442695, %v393_v45 }
 0x377   :  { %553 = vpow2.f32 %v394_v46 }
 0x381   :  { %v554_v47 = vpop.eup %553 }
 0x382   :  { %396 = vadd.xlane.f32.xlu0 %v554_v47 }
 0x40f   :  { %v397_v48 = vpop.xlane.xlu0 %396 }
 0x410   :  { %555 = vrcp.f32 %v397_v48 }
 0x41a   :  { %v556_v51 = vpop.eup %555 }
 0x41b   :  { %v399_v52 = vmul.f32 %v556_v51, %v554_v47 }
 0x41d   :  { %v405_v54 = vsel %vm402_vm2, %v399_v52, %v404_v53 }
 0x41e   :  { %v406_v55 = vpack.c.bf16 %v405_v54, %v405_v54 }
 0x420   :  { %407 = vst [vmem:[#allocation10] sm:$0xf] %v406_v55 }
 0x421   :  { %656 = shalt.err (!%p653_p8)
}
 0x422   :  { %s657_s8 = scalar_lea.hbm %s836_s7, 64 }
 0x423   :  { %p658_p9 = scmp.ne.s32.totalorder %s836_s7, %s657_s8  ;;  %p661_p10 = scmp.lt.u32.totalorder %s657_s8, %s836_s7 }
 0x425   :  { %p663_p11 = pnand %p661_p10, %p658_p9 }
 0x427   :  { %666 = shalt.err (!%p663_p11)
}
 0x428   :  { %417 = dma.vmem_to_hbm [thread:$0]  %s415_s6, 64, %s836_s7, [#allocation4]  }
 0x429   :  { %673 = dma.done.wait [#allocation4], 64  }
 0x42a   :  { %674 = vsyncadd [#allocation4], 4294967232 }
 0x42b   :  { %421 = vsyncpa [#allocation3], 1 }
 0x42c   :  { %422 = vsyncpa [#allocation6], 1 }
 0x42d   :  { %423 = vsyncpa [#allocation9], 1 }
 0x42e   :  { %424 = vsyncpa [#allocation4], 1 }

</bundles_post_ra>
